<compile_context>
chip_gen: v5e
topology: v5e:2x2
jax: 0.10.0
libtpu: 0.0.40
codegen_flags: <defaults>
</compile_context>

<pallas_src>
import functools

import jax
import jax.numpy as jnp
from jax import lax
from jax.experimental import pallas as pl
from jax.experimental.pallas import tpu as pltpu


def _round_up(x, m):
    return (x + m - 1) // m * m


def _ctrnn_kernel(one_minus_alpha, seq_len, t_blk, needs_mask, compute_dtype,
                  x_ref, w_rec_ref, w_in_ref, b_rec_ref, w_out_ref, b_out_ref,
                  out_ref, h_ref, h_buf_ref):
    c = pl.program_id(1)                       # time-chunk index (sequential)

    @pl.when(c == 0)
    def _():
        h_ref[...] = jnp.zeros_like(h_ref)     # h starts at zero per batch block

    # Weights are resident in VMEM (constant index_map); already transposed
    # and alpha-folded by the wrapper.
    w_rec = w_rec_ref[...]                     # (H, H)  contraction-ready
    w_in = w_in_ref[...]                       # (I, H)
    b_rec = b_rec_ref[...]                     # (1, H)  f32

    t0 = c * t_blk

    def step(s, h):
        x_t = x_ref[s].astype(compute_dtype)                        # (B, I)
        u = (jnp.dot(h.astype(compute_dtype), w_rec,
                     preferred_element_type=jnp.float32)
             + jnp.dot(x_t, w_in, preferred_element_type=jnp.float32)
             + b_rec)                                               # (B, H) f32
        h_new = jnp.maximum(one_minus_alpha * h + u, 0.0)           # leaky + ReLU
        if needs_mask:
            # Keep h frozen on padded timesteps (only the last chunk can pad).
            keep = (t0 + s < seq_len).astype(h_new.dtype)
            h_new = h + keep * (h_new - h)
        h_buf_ref[s] = h_new
        return h_new

    h_last = lax.fori_loop(0, t_blk, step, h_ref[...], unroll=True)
    h_ref[...] = h_last                        # one (B,H) store per chunk

    # Deferred output projection: one tall matmul per chunk instead of
    # t_blk tiny (B,H)@(H,O) matmuls.  Output block last dim is padded to a
    # multiple of 128, so the store is lane-dense (no masked vst).
    hb = h_buf_ref[...].astype(compute_dtype)
    t, b, h_dim = hb.shape
    y = (jnp.dot(hb.reshape(t * b, h_dim), w_out_ref[...],
                 preferred_element_type=jnp.float32)
         + b_out_ref[...])
    out_ref[...] = y.reshape(t, b, -1)


def ctrnn_forward(inputs, w_rec, w_in, b_rec, w_out, b_out, *,
                  dt=1.0, tau=100.0, t_blk=16, compute_dtype=jnp.float32):
    """inputs: (seq_len, batch, input_size) f32. Returns (outputs, h_final)."""
    seq_len, batch, input_size = inputs.shape
    hidden_size = w_rec.shape[0]
    output_size = w_out.shape[0]
    alpha = float(dt) / float(tau)

    # ---- pad to TPU-friendly shapes (8 sublanes x 128 lanes) --------------
    b_pad = _round_up(batch, 8)
    i_pad = _round_up(input_size, 128)
    h_pad = _round_up(hidden_size, 128)
    o_pad = _round_up(output_size, 128)

    t_blk = max(1, min(int(t_blk), seq_len))
    n_chunks = pl.cdiv(seq_len, t_blk)
    seq_pad = n_chunks * t_blk

    # Split batch into 2 parallel blocks when large enough (feeds both v7x
    # TensorCores via the "parallel" grid axis; no effect on v5e/v6e).
    n_b = 2 if (b_pad >= 16 and b_pad % 16 == 0) else 1
    b_blk = b_pad // n_b

    # ---- fold alpha into weights and pre-transpose once -------------------
    w_rec_k = (alpha * w_rec.T).astype(compute_dtype)   # (H, H) contraction-ready
    w_in_k = (alpha * w_in).astype(compute_dtype)       # (I, H)
    b_rec_k = (alpha * b_rec).reshape(1, hidden_size).astype(jnp.float32)
    w_out_k = w_out.T.astype(compute_dtype)             # (H, O)
    b_out_k = b_out.reshape(1, output_size).astype(jnp.float32)

    def pad2(a, rows, cols):
        return jnp.pad(a, ((0, rows - a.shape[0]), (0, cols - a.shape[1])))

    x_p = jnp.pad(inputs.astype(jnp.float32),
                  ((0, seq_pad - seq_len), (0, b_pad - batch),
                   (0, i_pad - input_size)))
    w_rec_p = pad2(w_rec_k, h_pad, h_pad)
    w_in_p = pad2(w_in_k, i_pad, h_pad)
    b_rec_p = pad2(b_rec_k, 1, h_pad)
    w_out_p = pad2(w_out_k, h_pad, o_pad)
    b_out_p = pad2(b_out_k, 1, o_pad)

    kernel = functools.partial(_ctrnn_kernel, 1.0 - alpha, seq_len, t_blk,
                               seq_pad != seq_len, compute_dtype)

    # Rough VMEM budget (double-buffered streaming tiles + resident weights),
    # clamped so it is valid on all generations (v7x has 64 MiB per TC).
    wt_b = jnp.dtype(compute_dtype).itemsize
    vmem_need = (
        2 * t_blk * b_blk * i_pad * 4                                  # x
        + (h_pad * h_pad + i_pad * h_pad + h_pad * o_pad) * wt_b       # weights
        + (h_pad + o_pad) * 4                                          # biases
        + 2 * t_blk * b_blk * o_pad * 4                                # out
        + 2 * b_blk * h_pad * 4                                        # h_final
        + t_blk * b_blk * h_pad * 4)                                   # h_buf
    vmem_limit = int(min(max(2 * vmem_need, 32 * 2**20), 64 * 2**20))

    outputs, h_final = pl.pallas_call(
        kernel,
        out_shape=(
            jax.ShapeDtypeStruct((seq_pad, b_pad, o_pad), jnp.float32),
            jax.ShapeDtypeStruct((b_pad, h_pad), jnp.float32),
        ),
        grid_spec=pltpu.PrefetchScalarGridSpec(
            num_scalar_prefetch=0,
            grid=(n_b, n_chunks),
            in_specs=[
                pl.BlockSpec((t_blk, b_blk, i_pad), lambda b, c: (c, b, 0)),
                pl.BlockSpec((h_pad, h_pad), lambda b, c: (0, 0)),
                pl.BlockSpec((i_pad, h_pad), lambda b, c: (0, 0)),
                pl.BlockSpec((1, h_pad), lambda b, c: (0, 0)),
                pl.BlockSpec((h_pad, o_pad), lambda b, c: (0, 0)),
                pl.BlockSpec((1, o_pad), lambda b, c: (0, 0)),
            ],
            out_specs=[
                pl.BlockSpec((t_blk, b_blk, o_pad), lambda b, c: (c, b, 0)),
                pl.BlockSpec((b_blk, h_pad), lambda b, c: (b, 0)),
            ],
            scratch_shapes=[pltpu.VMEM((t_blk, b_blk, h_pad), jnp.float32)],
        ),
        compiler_params=pltpu.CompilerParams(
            dimension_semantics=("parallel", "arbitrary"),  # time is sequential
            vmem_limit_bytes=vmem_limit,
        ),
    )(x_p, w_rec_p, w_in_p, b_rec_p, w_out_p, b_out_p)

    return (outputs[:seq_len, :batch, :output_size],
            h_final[:batch, :hidden_size])


def ctrnn_reference(inputs, w_rec, w_in, b_rec, w_out, b_out, *, dt=1.0, tau=100.0):
    """Pure-JAX reference mirroring the PyTorch forward."""
    seq_len, batch, _ = inputs.shape
    hidden_size = w_rec.shape[0]
    alpha = float(dt) / float(tau)
    h = jnp.zeros((batch, hidden_size), jnp.float32)
    outs = []
    for t in range(seq_len):
        x_t = inputs[t]
        u_t = h @ w_rec.T + x_t @ w_in + b_rec
        h = (1.0 - alpha) * h + alpha * u_t
        h = jnp.maximum(h, 0.0)
        outs.append(h @ w_out.T + b_out)
    return jnp.stack(outs), h


if __name__ == "__main__":
    # Small, deterministic example consistent with the module's forward:
    # inputs: (seq_len, batch, input_size)
    seq_len, batch = 8, 4
    input_size, hidden_size, output_size = 16, 32, 8
    dt, tau = 1.0, 100.0

    key = jax.random.PRNGKey(0)
    k1, k2, k3, k4, k5 = jax.random.split(key, 5)

    inputs = jax.random.normal(k1, (seq_len, batch, input_size), jnp.float32)
    w_rec = jax.random.normal(k2, (hidden_size, hidden_size), jnp.float32) / hidden_size ** 0.5
    w_in = jax.random.normal(k3, (input_size, hidden_size), jnp.float32) / input_size ** 0.5
    b_rec = jnp.zeros((hidden_size,), jnp.float32)
    # fc_out = nn.Linear(hidden_size, output_size): weight (O, H), bias (O,)
    w_out = jax.random.normal(k4, (output_size, hidden_size), jnp.float32) / hidden_size ** 0.5
    b_out = jax.random.normal(k5, (output_size,), jnp.float32) * 0.1

    outputs, h_final = ctrnn_forward(inputs, w_rec, w_in, b_rec, w_out, b_out,
                                     dt=dt, tau=tau, t_blk=8,
                                     compute_dtype=jnp.float32)
    outputs = jax.block_until_ready(outputs)
    h_final = jax.block_until_ready(h_final)

    ref_out, ref_h = ctrnn_reference(inputs, w_rec, w_in, b_rec, w_out, b_out,
                                     dt=dt, tau=tau)
    assert outputs.shape == (seq_len, batch, output_size)
    assert h_final.shape == (batch, hidden_size)
    assert jnp.allclose(outputs, ref_out, atol=1e-4, rtol=1e-4)
    assert jnp.allclose(h_final, ref_h, atol=1e-4, rtol=1e-4)

    print("KERNEL_OK")
</pallas_src>

<mosaic_0001>
module attributes {stable_mosaic.version = 11 : i64} {
  func.func @_ctrnn_kernel(%arg0: i32, %arg1: i32, %arg2: memref<8x8x128xf32, #tpu.memory_space<vmem>>, %arg3: memref<128x128xf32, #tpu.memory_space<vmem>>, %arg4: memref<128x128xf32, #tpu.memory_space<vmem>>, %arg5: memref<1x128xf32, #tpu.memory_space<vmem>>, %arg6: memref<128x128xf32, #tpu.memory_space<vmem>>, %arg7: memref<1x128xf32, #tpu.memory_space<vmem>>, %arg8: memref<8x8x128xf32, #tpu.memory_space<vmem>>, %arg9: memref<8x128xf32, #tpu.memory_space<vmem>>, %arg10: memref<8x8x128xf32, #tpu.memory_space<vmem>>) attributes {dimension_semantics = [#tpu.dimension_semantics<parallel>, #tpu.dimension_semantics<arbitrary>], iteration_bounds = array<i64: 1, 1>, scalar_prefetch = 0 : i64, scratch_operands = 1 : i64, tpu.core_type = #tpu.core_type<tc>, window_params = [{transform_indices = @transform_0, window_bounds = array<i64: 8, 8, 128>}, {pipeline_mode = #tpu.pipeline_mode<synchronous>, transform_indices = @transform_1, window_bounds = array<i64: 128, 128>}, {pipeline_mode = #tpu.pipeline_mode<synchronous>, transform_indices = @transform_2, window_bounds = array<i64: 128, 128>}, {pipeline_mode = #tpu.pipeline_mode<synchronous>, transform_indices = @transform_3, window_bounds = array<i64: 1, 128>}, {pipeline_mode = #tpu.pipeline_mode<synchronous>, transform_indices = @transform_4, window_bounds = array<i64: 128, 128>}, {pipeline_mode = #tpu.pipeline_mode<synchronous>, transform_indices = @transform_5, window_bounds = array<i64: 1, 128>}, {transform_indices = @transform_6, window_bounds = array<i64: 8, 8, 128>}, {transform_indices = @transform_7, window_bounds = array<i64: 8, 128>}]} {
    %c0_i32 = arith.constant 0 : i32
    %0 = arith.cmpi eq, %arg1, %c0_i32 : i32
    %1 = arith.extui %0 : i1 to i32
    %c0_i32_0 = arith.constant 0 : i32
    %2 = arith.cmpi ne, %1, %c0_i32_0 : i32
    scf.if %2 {
      %cst_85 = arith.constant 0.000000e+00 : f32
      %153 = vector.broadcast %cst_85 : f32 to vector<8x128xf32>
      %c0_86 = arith.constant 0 : index
      %c0_87 = arith.constant 0 : index
      %154 = vector.load %arg9[%c0_86, %c0_87] : memref<8x128xf32, #tpu.memory_space<vmem>>, vector<8x128xf32>
      tpu.vector_store %arg9[%c0_86, %c0_87], %153 {strides = array<i32>} : memref<8x128xf32, #tpu.memory_space<vmem>>, vector<8x128xf32>,
    } else {
    }
    %c0 = arith.constant 0 : index
    %c0_1 = arith.constant 0 : index
    %3 = vector.load %arg3[%c0, %c0_1] : memref<128x128xf32, #tpu.memory_space<vmem>>, vector<128x128xf32>
    %c0_2 = arith.constant 0 : index
    %c0_3 = arith.constant 0 : index
    %4 = vector.load %arg4[%c0_2, %c0_3] : memref<128x128xf32, #tpu.memory_space<vmem>>, vector<128x128xf32>
    %c0_4 = arith.constant 0 : index
    %c0_5 = arith.constant 0 : index
    %5 = vector.load %arg5[%c0_4, %c0_5] : memref<1x128xf32, #tpu.memory_space<vmem>>, vector<1x128xf32>
    %c0_6 = arith.constant 0 : index
    %c0_7 = arith.constant 0 : index
    %6 = vector.load %arg9[%c0_6, %c0_7] : memref<8x128xf32, #tpu.memory_space<vmem>>, vector<8x128xf32>
    %c0_i32_8 = arith.constant 0 : i32
    %7 = arith.index_cast %c0_i32_8 : i32 to index
    %c0_9 = arith.constant 0 : index
    %c0_10 = arith.constant 0 : index
    %8 = vector.load %arg2[%7, %c0_9, %c0_10] : memref<8x8x128xf32, #tpu.memory_space<vmem>>, vector<1x8x128xf32>
    %9 = vector.shape_cast %8 : vector<1x8x128xf32> to vector<8x128xf32>
    %cst = arith.constant dense<0.000000e+00> : vector<8x128xf32>
    %10 = tpu.matmul %6, %3, %cst {dimension_numbers = #tpu.dot_dimension_numbers<[1], [0], [0], [1], [0, 0, 1, 1], [], []>} : vector<8x128xf32>, vector<128x128xf32>, vector<8x128xf32> -> vector<8x128xf32>
    %cst_11 = arith.constant dense<0.000000e+00> : vector<8x128xf32>
    %11 = tpu.matmul %9, %4, %cst_11 {dimension_numbers = #tpu.dot_dimension_numbers<[1], [0], [0], [1], [0, 0, 1, 1], [], []>} : vector<8x128xf32>, vector<128x128xf32>, vector<8x128xf32> -> vector<8x128xf32>
    %12 = arith.addf %10, %11 : vector<8x128xf32>
    %13 = vector.broadcast %5 : vector<1x128xf32> to vector<8x128xf32>
    %14 = arith.addf %12, %13 : vector<8x128xf32>
    %cst_12 = arith.constant 9.900000e-01 : f32
    %15 = vector.broadcast %cst_12 : f32 to vector<8x128xf32>
    %16 = arith.mulf %15, %6 : vector<8x128xf32>
    %17 = arith.addf %16, %14 : vector<8x128xf32>
    %cst_13 = arith.constant 0.000000e+00 : f32
    %18 = vector.broadcast %cst_13 : f32 to vector<8x128xf32>
    %19 = arith.maximumf %17, %18 : vector<8x128xf32>
    %20 = arith.index_cast %c0_i32_8 : i32 to index
    %c0_14 = arith.constant 0 : index
    %c0_15 = arith.constant 0 : index
    %21 = vector.load %arg10[%20, %c0_14, %c0_15] : memref<8x8x128xf32, #tpu.memory_space<vmem>>, vector<1x8x128xf32>
    %22 = vector.shape_cast %21 : vector<1x8x128xf32> to vector<8x128xf32>
    %23 = vector.shape_cast %19 : vector<8x128xf32> to vector<1x8x128xf32>
    tpu.vector_store %arg10[%20, %c0_14, %c0_15], %23 {strides = array<i32>} : memref<8x8x128xf32, #tpu.memory_space<vmem>>, vector<1x8x128xf32>,
    %c1_i32 = arith.constant 1 : i32
    %24 = arith.index_cast %c1_i32 : i32 to index
    %c0_16 = arith.constant 0 : index
    %c0_17 = arith.constant 0 : index
    %25 = vector.load %arg2[%24, %c0_16, %c0_17] : memref<8x8x128xf32, #tpu.memory_space<vmem>>, vector<1x8x128xf32>
    %26 = vector.shape_cast %25 : vector<1x8x128xf32> to vector<8x128xf32>
    %cst_18 = arith.constant dense<0.000000e+00> : vector<8x128xf32>
    %27 = tpu.matmul %19, %3, %cst_18 {dimension_numbers = #tpu.dot_dimension_numbers<[1], [0], [0], [1], [0, 0, 1, 1], [], []>} : vector<8x128xf32>, vector<128x128xf32>, vector<8x128xf32> -> vector<8x128xf32>
    %cst_19 = arith.constant dense<0.000000e+00> : vector<8x128xf32>
    %28 = tpu.matmul %26, %4, %cst_19 {dimension_numbers = #tpu.dot_dimension_numbers<[1], [0], [0], [1], [0, 0, 1, 1], [], []>} : vector<8x128xf32>, vector<128x128xf32>, vector<8x128xf32> -> vector<8x128xf32>
    %29 = arith.addf %27, %28 : vector<8x128xf32>
    %30 = vector.broadcast %5 : vector<1x128xf32> to vector<8x128xf32>
    %31 = arith.addf %29, %30 : vector<8x128xf32>
    %cst_20 = arith.constant 9.900000e-01 : f32
    %32 = vector.broadcast %cst_20 : f32 to vector<8x128xf32>
    %33 = arith.mulf %32, %19 : vector<8x128xf32>
    %34 = arith.addf %33, %31 : vector<8x128xf32>
    %cst_21 = arith.constant 0.000000e+00 : f32
    %35 = vector.broadcast %cst_21 : f32 to vector<8x128xf32>
    %36 = arith.maximumf %34, %35 : vector<8x128xf32>
    %37 = arith.index_cast %c1_i32 : i32 to index
    %c0_22 = arith.constant 0 : index
    %c0_23 = arith.constant 0 : index
    %38 = vector.load %arg10[%37, %c0_22, %c0_23] : memref<8x8x128xf32, #tpu.memory_space<vmem>>, vector<1x8x128xf32>
    %39 = vector.shape_cast %38 : vector<1x8x128xf32> to vector<8x128xf32>
    %40 = vector.shape_cast %36 : vector<8x128xf32> to vector<1x8x128xf32>
    tpu.vector_store %arg10[%37, %c0_22, %c0_23], %40 {strides = array<i32>} : memref<8x8x128xf32, #tpu.memory_space<vmem>>, vector<1x8x128xf32>,
    %c2_i32 = arith.constant 2 : i32
    %41 = arith.index_cast %c2_i32 : i32 to index
    %c0_24 = arith.constant 0 : index
    %c0_25 = arith.constant 0 : index
    %42 = vector.load %arg2[%41, %c0_24, %c0_25] : memref<8x8x128xf32, #tpu.memory_space<vmem>>, vector<1x8x128xf32>
    %43 = vector.shape_cast %42 : vector<1x8x128xf32> to vector<8x128xf32>
    %cst_26 = arith.constant dense<0.000000e+00> : vector<8x128xf32>
    %44 = tpu.matmul %36, %3, %cst_26 {dimension_numbers = #tpu.dot_dimension_numbers<[1], [0], [0], [1], [0, 0, 1, 1], [], []>} : vector<8x128xf32>, vector<128x128xf32>, vector<8x128xf32> -> vector<8x128xf32>
    %cst_27 = arith.constant dense<0.000000e+00> : vector<8x128xf32>
    %45 = tpu.matmul %43, %4, %cst_27 {dimension_numbers = #tpu.dot_dimension_numbers<[1], [0], [0], [1], [0, 0, 1, 1], [], []>} : vector<8x128xf32>, vector<128x128xf32>, vector<8x128xf32> -> vector<8x128xf32>
    %46 = arith.addf %44, %45 : vector<8x128xf32>
    %47 = vector.broadcast %5 : vector<1x128xf32> to vector<8x128xf32>
    %48 = arith.addf %46, %47 : vector<8x128xf32>
    %cst_28 = arith.constant 9.900000e-01 : f32
    %49 = vector.broadcast %cst_28 : f32 to vector<8x128xf32>
    %50 = arith.mulf %49, %36 : vector<8x128xf32>
    %51 = arith.addf %50, %48 : vector<8x128xf32>
    %cst_29 = arith.constant 0.000000e+00 : f32
    %52 = vector.broadcast %cst_29 : f32 to vector<8x128xf32>
    %53 = arith.maximumf %51, %52 : vector<8x128xf32>
    %54 = arith.index_cast %c2_i32 : i32 to index
    %c0_30 = arith.constant 0 : index
    %c0_31 = arith.constant 0 : index
    %55 = vector.load %arg10[%54, %c0_30, %c0_31] : memref<8x8x128xf32, #tpu.memory_space<vmem>>, vector<1x8x128xf32>
    %56 = vector.shape_cast %55 : vector<1x8x128xf32> to vector<8x128xf32>
    %57 = vector.shape_cast %53 : vector<8x128xf32> to vector<1x8x128xf32>
    tpu.vector_store %arg10[%54, %c0_30, %c0_31], %57 {strides = array<i32>} : memref<8x8x128xf32, #tpu.memory_space<vmem>>, vector<1x8x128xf32>,
    %c3_i32 = arith.constant 3 : i32
    %58 = arith.index_cast %c3_i32 : i32 to index
    %c0_32 = arith.constant 0 : index
    %c0_33 = arith.constant 0 : index
    %59 = vector.load %arg2[%58, %c0_32, %c0_33] : memref<8x8x128xf32, #tpu.memory_space<vmem>>, vector<1x8x128xf32>
    %60 = vector.shape_cast %59 : vector<1x8x128xf32> to vector<8x128xf32>
    %cst_34 = arith.constant dense<0.000000e+00> : vector<8x128xf32>
    %61 = tpu.matmul %53, %3, %cst_34 {dimension_numbers = #tpu.dot_dimension_numbers<[1], [0], [0], [1], [0, 0, 1, 1], [], []>} : vector<8x128xf32>, vector<128x128xf32>, vector<8x128xf32> -> vector<8x128xf32>
    %cst_35 = arith.constant dense<0.000000e+00> : vector<8x128xf32>
    %62 = tpu.matmul %60, %4, %cst_35 {dimension_numbers = #tpu.dot_dimension_numbers<[1], [0], [0], [1], [0, 0, 1, 1], [], []>} : vector<8x128xf32>, vector<128x128xf32>, vector<8x128xf32> -> vector<8x128xf32>
    %63 = arith.addf %61, %62 : vector<8x128xf32>
    %64 = vector.broadcast %5 : vector<1x128xf32> to vector<8x128xf32>
    %65 = arith.addf %63, %64 : vector<8x128xf32>
    %cst_36 = arith.constant 9.900000e-01 : f32
    %66 = vector.broadcast %cst_36 : f32 to vector<8x128xf32>
    %67 = arith.mulf %66, %53 : vector<8x128xf32>
    %68 = arith.addf %67, %65 : vector<8x128xf32>
    %cst_37 = arith.constant 0.000000e+00 : f32
    %69 = vector.broadcast %cst_37 : f32 to vector<8x128xf32>
    %70 = arith.maximumf %68, %69 : vector<8x128xf32>
    %71 = arith.index_cast %c3_i32 : i32 to index
    %c0_38 = arith.constant 0 : index
    %c0_39 = arith.constant 0 : index
    %72 = vector.load %arg10[%71, %c0_38, %c0_39] : memref<8x8x128xf32, #tpu.memory_space<vmem>>, vector<1x8x128xf32>
    %73 = vector.shape_cast %72 : vector<1x8x128xf32> to vector<8x128xf32>
    %74 = vector.shape_cast %70 : vector<8x128xf32> to vector<1x8x128xf32>
    tpu.vector_store %arg10[%71, %c0_38, %c0_39], %74 {strides = array<i32>} : memref<8x8x128xf32, #tpu.memory_space<vmem>>, vector<1x8x128xf32>,
    %c4_i32 = arith.constant 4 : i32
    %75 = arith.index_cast %c4_i32 : i32 to index
    %c0_40 = arith.constant 0 : index
    %c0_41 = arith.constant 0 : index
    %76 = vector.load %arg2[%75, %c0_40, %c0_41] : memref<8x8x128xf32, #tpu.memory_space<vmem>>, vector<1x8x128xf32>
    %77 = vector.shape_cast %76 : vector<1x8x128xf32> to vector<8x128xf32>
    %cst_42 = arith.constant dense<0.000000e+00> : vector<8x128xf32>
    %78 = tpu.matmul %70, %3, %cst_42 {dimension_numbers = #tpu.dot_dimension_numbers<[1], [0], [0], [1], [0, 0, 1, 1], [], []>} : vector<8x128xf32>, vector<128x128xf32>, vector<8x128xf32> -> vector<8x128xf32>
    %cst_43 = arith.constant dense<0.000000e+00> : vector<8x128xf32>
    %79 = tpu.matmul %77, %4, %cst_43 {dimension_numbers = #tpu.dot_dimension_numbers<[1], [0], [0], [1], [0, 0, 1, 1], [], []>} : vector<8x128xf32>, vector<128x128xf32>, vector<8x128xf32> -> vector<8x128xf32>
    %80 = arith.addf %78, %79 : vector<8x128xf32>
    %81 = vector.broadcast %5 : vector<1x128xf32> to vector<8x128xf32>
    %82 = arith.addf %80, %81 : vector<8x128xf32>
    %cst_44 = arith.constant 9.900000e-01 : f32
    %83 = vector.broadcast %cst_44 : f32 to vector<8x128xf32>
    %84 = arith.mulf %83, %70 : vector<8x128xf32>
    %85 = arith.addf %84, %82 : vector<8x128xf32>
    %cst_45 = arith.constant 0.000000e+00 : f32
    %86 = vector.broadcast %cst_45 : f32 to vector<8x128xf32>
    %87 = arith.maximumf %85, %86 : vector<8x128xf32>
    %88 = arith.index_cast %c4_i32 : i32 to index
    %c0_46 = arith.constant 0 : index
    %c0_47 = arith.constant 0 : index
    %89 = vector.load %arg10[%88, %c0_46, %c0_47] : memref<8x8x128xf32, #tpu.memory_space<vmem>>, vector<1x8x128xf32>
    %90 = vector.shape_cast %89 : vector<1x8x128xf32> to vector<8x128xf32>
    %91 = vector.shape_cast %87 : vector<8x128xf32> to vector<1x8x128xf32>
    tpu.vector_store %arg10[%88, %c0_46, %c0_47], %91 {strides = array<i32>} : memref<8x8x128xf32, #tpu.memory_space<vmem>>, vector<1x8x128xf32>,
    %c5_i32 = arith.constant 5 : i32
    %92 = arith.index_cast %c5_i32 : i32 to index
    %c0_48 = arith.constant 0 : index
    %c0_49 = arith.constant 0 : index
    %93 = vector.load %arg2[%92, %c0_48, %c0_49] : memref<8x8x128xf32, #tpu.memory_space<vmem>>, vector<1x8x128xf32>
    %94 = vector.shape_cast %93 : vector<1x8x128xf32> to vector<8x128xf32>
    %cst_50 = arith.constant dense<0.000000e+00> : vector<8x128xf32>
    %95 = tpu.matmul %87, %3, %cst_50 {dimension_numbers = #tpu.dot_dimension_numbers<[1], [0], [0], [1], [0, 0, 1, 1], [], []>} : vector<8x128xf32>, vector<128x128xf32>, vector<8x128xf32> -> vector<8x128xf32>
    %cst_51 = arith.constant dense<0.000000e+00> : vector<8x128xf32>
    %96 = tpu.matmul %94, %4, %cst_51 {dimension_numbers = #tpu.dot_dimension_numbers<[1], [0], [0], [1], [0, 0, 1, 1], [], []>} : vector<8x128xf32>, vector<128x128xf32>, vector<8x128xf32> -> vector<8x128xf32>
    %97 = arith.addf %95, %96 : vector<8x128xf32>
    %98 = vector.broadcast %5 : vector<1x128xf32> to vector<8x128xf32>
    %99 = arith.addf %97, %98 : vector<8x128xf32>
    %cst_52 = arith.constant 9.900000e-01 : f32
    %100 = vector.broadcast %cst_52 : f32 to vector<8x128xf32>
    %101 = arith.mulf %100, %87 : vector<8x128xf32>
    %102 = arith.addf %101, %99 : vector<8x128xf32>
    %cst_53 = arith.constant 0.000000e+00 : f32
    %103 = vector.broadcast %cst_53 : f32 to vector<8x128xf32>
    %104 = arith.maximumf %102, %103 : vector<8x128xf32>
    %105 = arith.index_cast %c5_i32 : i32 to index
    %c0_54 = arith.constant 0 : index
    %c0_55 = arith.constant 0 : index
    %106 = vector.load %arg10[%105, %c0_54, %c0_55] : memref<8x8x128xf32, #tpu.memory_space<vmem>>, vector<1x8x128xf32>
    %107 = vector.shape_cast %106 : vector<1x8x128xf32> to vector<8x128xf32>
    %108 = vector.shape_cast %104 : vector<8x128xf32> to vector<1x8x128xf32>
    tpu.vector_store %arg10[%105, %c0_54, %c0_55], %108 {strides = array<i32>} : memref<8x8x128xf32, #tpu.memory_space<vmem>>, vector<1x8x128xf32>,
    %c6_i32 = arith.constant 6 : i32
    %109 = arith.index_cast %c6_i32 : i32 to index
    %c0_56 = arith.constant 0 : index
    %c0_57 = arith.constant 0 : index
    %110 = vector.load %arg2[%109, %c0_56, %c0_57] : memref<8x8x128xf32, #tpu.memory_space<vmem>>, vector<1x8x128xf32>
    %111 = vector.shape_cast %110 : vector<1x8x128xf32> to vector<8x128xf32>
    %cst_58 = arith.constant dense<0.000000e+00> : vector<8x128xf32>
    %112 = tpu.matmul %104, %3, %cst_58 {dimension_numbers = #tpu.dot_dimension_numbers<[1], [0], [0], [1], [0, 0, 1, 1], [], []>} : vector<8x128xf32>, vector<128x128xf32>, vector<8x128xf32> -> vector<8x128xf32>
    %cst_59 = arith.constant dense<0.000000e+00> : vector<8x128xf32>
    %113 = tpu.matmul %111, %4, %cst_59 {dimension_numbers = #tpu.dot_dimension_numbers<[1], [0], [0], [1], [0, 0, 1, 1], [], []>} : vector<8x128xf32>, vector<128x128xf32>, vector<8x128xf32> -> vector<8x128xf32>
    %114 = arith.addf %112, %113 : vector<8x128xf32>
    %115 = vector.broadcast %5 : vector<1x128xf32> to vector<8x128xf32>
    %116 = arith.addf %114, %115 : vector<8x128xf32>
    %cst_60 = arith.constant 9.900000e-01 : f32
    %117 = vector.broadcast %cst_60 : f32 to vector<8x128xf32>
    %118 = arith.mulf %117, %104 : vector<8x128xf32>
    %119 = arith.addf %118, %116 : vector<8x128xf32>
    %cst_61 = arith.constant 0.000000e+00 : f32
    %120 = vector.broadcast %cst_61 : f32 to vector<8x128xf32>
    %121 = arith.maximumf %119, %120 : vector<8x128xf32>
    %122 = arith.index_cast %c6_i32 : i32 to index
    %c0_62 = arith.constant 0 : index
    %c0_63 = arith.constant 0 : index
    %123 = vector.load %arg10[%122, %c0_62, %c0_63] : memref<8x8x128xf32, #tpu.memory_space<vmem>>, vector<1x8x128xf32>
    %124 = vector.shape_cast %123 : vector<1x8x128xf32> to vector<8x128xf32>
    %125 = vector.shape_cast %121 : vector<8x128xf32> to vector<1x8x128xf32>
    tpu.vector_store %arg10[%122, %c0_62, %c0_63], %125 {strides = array<i32>} : memref<8x8x128xf32, #tpu.memory_space<vmem>>, vector<1x8x128xf32>,
    %c7_i32 = arith.constant 7 : i32
    %126 = arith.index_cast %c7_i32 : i32 to index
    %c0_64 = arith.constant 0 : index
    %c0_65 = arith.constant 0 : index
    %127 = vector.load %arg2[%126, %c0_64, %c0_65] : memref<8x8x128xf32, #tpu.memory_space<vmem>>, vector<1x8x128xf32>
    %128 = vector.shape_cast %127 : vector<1x8x128xf32> to vector<8x128xf32>
    %cst_66 = arith.constant dense<0.000000e+00> : vector<8x128xf32>
    %129 = tpu.matmul %121, %3, %cst_66 {dimension_numbers = #tpu.dot_dimension_numbers<[1], [0], [0], [1], [0, 0, 1, 1], [], []>} : vector<8x128xf32>, vector<128x128xf32>, vector<8x128xf32> -> vector<8x128xf32>
    %cst_67 = arith.constant dense<0.000000e+00> : vector<8x128xf32>
    %130 = tpu.matmul %128, %4, %cst_67 {dimension_numbers = #tpu.dot_dimension_numbers<[1], [0], [0], [1], [0, 0, 1, 1], [], []>} : vector<8x128xf32>, vector<128x128xf32>, vector<8x128xf32> -> vector<8x128xf32>
    %131 = arith.addf %129, %130 : vector<8x128xf32>
    %132 = vector.broadcast %5 : vector<1x128xf32> to vector<8x128xf32>
    %133 = arith.addf %131, %132 : vector<8x128xf32>
    %cst_68 = arith.constant 9.900000e-01 : f32
    %134 = vector.broadcast %cst_68 : f32 to vector<8x128xf32>
    %135 = arith.mulf %134, %121 : vector<8x128xf32>
    %136 = arith.addf %135, %133 : vector<8x128xf32>
    %cst_69 = arith.constant 0.000000e+00 : f32
    %137 = vector.broadcast %cst_69 : f32 to vector<8x128xf32>
    %138 = arith.maximumf %136, %137 : vector<8x128xf32>
    %139 = arith.index_cast %c7_i32 : i32 to index
    %c0_70 = arith.constant 0 : index
    %c0_71 = arith.constant 0 : index
    %140 = vector.load %arg10[%139, %c0_70, %c0_71] : memref<8x8x128xf32, #tpu.memory_space<vmem>>, vector<1x8x128xf32>
    %141 = vector.shape_cast %140 : vector<1x8x128xf32> to vector<8x128xf32>
    %142 = vector.shape_cast %138 : vector<8x128xf32> to vector<1x8x128xf32>
    tpu.vector_store %arg10[%139, %c0_70, %c0_71], %142 {strides = array<i32>} : memref<8x8x128xf32, #tpu.memory_space<vmem>>, vector<1x8x128xf32>,
    %c8_i32 = arith.constant 8 : i32
    %c0_72 = arith.constant 0 : index
    %c0_73 = arith.constant 0 : index
    %143 = vector.load %arg9[%c0_72, %c0_73] : memref<8x128xf32, #tpu.memory_space<vmem>>, vector<8x128xf32>
    tpu.vector_store %arg9[%c0_72, %c0_73], %138 {strides = array<i32>} : memref<8x128xf32, #tpu.memory_space<vmem>>, vector<8x128xf32>,
    %c0_74 = arith.constant 0 : index
    %c0_75 = arith.constant 0 : index
    %c0_76 = arith.constant 0 : index
    %144 = vector.load %arg10[%c0_74, %c0_75, %c0_76] : memref<8x8x128xf32, #tpu.memory_space<vmem>>, vector<8x8x128xf32>
    %145 = vector.shape_cast %144 : vector<8x8x128xf32> to vector<64x128xf32>
    %c0_77 = arith.constant 0 : index
    %c0_78 = arith.constant 0 : index
    %146 = vector.load %arg6[%c0_77, %c0_78] : memref<128x128xf32, #tpu.memory_space<vmem>>, vector<128x128xf32>
    %cst_79 = arith.constant dense<0.000000e+00> : vector<64x128xf32>
    %147 = tpu.matmul %145, %146, %cst_79 {dimension_numbers = #tpu.dot_dimension_numbers<[1], [0], [0], [1], [0, 0, 1, 1], [], []>} : vector<64x128xf32>, vector<128x128xf32>, vector<64x128xf32> -> vector<64x128xf32>
    %c0_80 = arith.constant 0 : index
    %c0_81 = arith.constant 0 : index
    %148 = vector.load %arg7[%c0_80, %c0_81] : memref<1x128xf32, #tpu.memory_space<vmem>>, vector<1x128xf32>
    %149 = vector.broadcast %148 : vector<1x128xf32> to vector<64x128xf32>
    %150 = arith.addf %147, %149 : vector<64x128xf32>
    %151 = vector.shape_cast %150 : vector<64x128xf32> to vector<8x8x128xf32>
    %c0_82 = arith.constant 0 : index
    %c0_83 = arith.constant 0 : index
    %c0_84 = arith.constant 0 : index
    %152 = vector.load %arg8[%c0_82, %c0_83, %c0_84] : memref<8x8x128xf32, #tpu.memory_space<vmem>>, vector<8x8x128xf32>
    tpu.vector_store %arg8[%c0_82, %c0_83, %c0_84], %151 {strides = array<i32>} : memref<8x8x128xf32, #tpu.memory_space<vmem>>, vector<8x8x128xf32>,
    return
  }
  func.func @transform_0(%arg0: i32, %arg1: i32) -> (i32, i32, i32) {
    %c0_i32 = arith.constant 0 : i32
    %c0_i32_0 = arith.constant 0 : i32
    return %arg1, %arg0, %c0_i32 : i32, i32, i32
  }
  func.func @transform_1(%arg0: i32, %arg1: i32) -> (i32, i32) {
    %c0_i32 = arith.constant 0 : i32
    %c0_i32_0 = arith.constant 0 : i32
    %c0_i32_1 = arith.constant 0 : i32
    return %c0_i32, %c0_i32_0 : i32, i32
  }
  func.func @transform_2(%arg0: i32, %arg1: i32) -> (i32, i32) {
    %c0_i32 = arith.constant 0 : i32
    %c0_i32_0 = arith.constant 0 : i32
    %c0_i32_1 = arith.constant 0 : i32
    return %c0_i32, %c0_i32_0 : i32, i32
  }
  func.func @transform_3(%arg0: i32, %arg1: i32) -> (i32, i32) {
    %c0_i32 = arith.constant 0 : i32
    %c0_i32_0 = arith.constant 0 : i32
    %c0_i32_1 = arith.constant 0 : i32
    return %c0_i32, %c0_i32_0 : i32, i32
  }
  func.func @transform_4(%arg0: i32, %arg1: i32) -> (i32, i32) {
    %c0_i32 = arith.constant 0 : i32
    %c0_i32_0 = arith.constant 0 : i32
    %c0_i32_1 = arith.constant 0 : i32
    return %c0_i32, %c0_i32_0 : i32, i32
  }
  func.func @transform_5(%arg0: i32, %arg1: i32) -> (i32, i32) {
    %c0_i32 = arith.constant 0 : i32
    %c0_i32_0 = arith.constant 0 : i32
    %c0_i32_1 = arith.constant 0 : i32
    return %c0_i32, %c0_i32_0 : i32, i32
  }
  func.func @transform_6(%arg0: i32, %arg1: i32) -> (i32, i32, i32) {
    %c0_i32 = arith.constant 0 : i32
    %c0_i32_0 = arith.constant 0 : i32
    return %arg1, %arg0, %c0_i32 : i32, i32, i32
  }
  func.func @transform_7(%arg0: i32, %arg1: i32) -> (i32, i32) {
    %c0_i32 = arith.constant 0 : i32
    %c0_i32_0 = arith.constant 0 : i32
    return %arg0, %c0_i32 : i32, i32
  }
}

</mosaic_0001>

<bundles_post_ra>
// kernel: tpu_custom_call.1
= control target key start
LH: loop header
LB: loop body
LE: loop exit
PB: predicated region body
PF: predicated region fallthrough
CT: control target
= control target key end

     0   :  { %13 = vsyncpa [#allocation4], 0  ;;  %s1228_s0 = inlined_call_operand.hbm [shape: f32[8,8,128], index: 0, kind: input, shape index: {}]   ;;  %s1229_s1 = inlined_call_operand.hbm [shape: f32[128,128], index: 1, kind: input, shape index: {}]   ;;  %s1230_s2 = inlined_call_operand.hbm [shape: f32[128,128], index: 2, kind: input, shape index: {}]   ;;  %s1231_s3 = inlined_call_operand.vmem [shape: f32[1,128], index: 3, kind: input, shape index: {}]   ;;  %s1232_s4 = inlined_call_operand.hbm [shape: f32[128,128], index: 4, kind: input, shape index: {}]   ;;  %s1233_s5 = inlined_call_operand.vmem [shape: f32[1,128], index: 5, kind: input, shape index: {}]   ;;  %s1234_s6 = inlined_call_operand.hbm [shape: f32[8,8,128], index: 6, kind: output, shape index: {0}]   ;;  %s1235_s7 = inlined_call_operand.hbm [shape: f32[8,128], index: 7, kind: output, shape index: {1}]  }
   0x1   :  { %14 = vsyncpa [#allocation7], 0 }
   0x2   :  { %15 = vsyncpa [#allocation10], 0 }
   0x3   :  { %16 = vsyncpa [#allocation5], 0 }
   0x4   :  { %17 = vsyncpa [#allocation13], 0  ;;  %s35_s26 = sshll.u32 %s1229_s1, 4  ;;  %s794_s27 = smov [#allocation6]   ;;  %s36_s26 = int_to_ptr.hbm [resolvable:$true] %s35_s26 }
   0x5   :  { %s37_s28 = sshll.u32 %s794_s27, 4  ;;  %s22_s8 = sshll.u32 %s1228_s0, 4  ;;  %s38_s28 = int_to_ptr.vmem [resolvable:$true] %s37_s28  ;;  %s23_s8 = int_to_ptr.hbm [resolvable:$true] %s22_s8 }
   0x6   :  { %s795_s9 = smov 128   ;;  %s796_s10 = smov 8  }
   0x7   :  { %43 = dma.hbm_to_vmem [thread:$0]  %s36_s26, 2048, %s38_s28, [#allocation7], %s795_s9, %s795_s9, %s796_s10  }
   0x8   :  { %s797_s11 = smov [#allocation3]   ;;  %s48_s1 = sshll.u32 %s1230_s2, 4  ;;  %s49_s1 = int_to_ptr.hbm [resolvable:$true] %s48_s1 }
   0x9   :  { %s24_s12 = sshll.u32 %s797_s11, 4  ;;  %s63_s16 = sshll.u32 %s1232_s4, 4  ;;  %s25_s12 = int_to_ptr.vmem [resolvable:$true] %s24_s12  ;;  %s64_s16 = int_to_ptr.hbm [resolvable:$true] %s63_s16 }
   0xa   :  { %30 = dma.hbm_to_vmem [thread:$0]  %s23_s8, 1024, %s25_s12, [#allocation4], %s795_s9, %s795_s9, %s796_s10  }
   0xb   :  { %s798_s17 = smov [#allocation8]   ;;  %s799_s19 = smov [#allocation9]  }
   0xc   :  { %s50_s18 = sshll.u32 %s798_s17, 4  ;;  %s65_s2 = sshll.u32 %s799_s19, 4  ;;  %s51_s18 = int_to_ptr.vmem [resolvable:$true] %s50_s18  ;;  %s66_s2 = int_to_ptr.vmem [resolvable:$true] %s65_s2 }
   0xd   :  { %56 = dma.hbm_to_vmem [thread:$0]  %s49_s1, 2048, %s51_s18, [#allocation7], %s795_s9, %s795_s9, %s796_s10  }
   0xe   :  { %71 = dma.hbm_to_vmem [thread:$0]  %s64_s16, 2048, %s66_s2, [#allocation10], %s795_s9, %s795_s9, %s796_s10  }
   0xf   :  { %784 = dma.done.wait [#allocation4], 1024  }
  0x10   :  { %785 = vsyncadd [#allocation4], 4294966272 }
  0x11   :  { %786 = dma.done.wait [#allocation7], 4096  }
  0x12   :  { %787 = vsyncadd [#allocation7], 4294963200 }
  0x13   :  { %788 = dma.done.wait [#allocation10], 2048  }
  0x14   :  { %789 = vsyncadd [#allocation10], 4294965248  ;;  %v867_v0 = vld [vmem:[#allocation8 + $0x78] sm:$0xff]  ;;  %v869_v1 = vld [vmem:[#allocation8 + $0x70] sm:$0xff]  ;;  %v800_v36 = vmov 0.0   ;;  %s612_s25 = sshll.u32 %s1235_s7, 4  ;;  %s613_s25 = int_to_ptr.hbm [resolvable:$true] %s612_s25 }
  0x15   :  { %130 = vmatpush.msra.mxu1 %v867_v0  ;;  %324 = vmatpush.msra.mxu0 %v867_v0  ;;  %v873_v2 = vld [vmem:[#allocation8 + $0x68] sm:$0xff]  ;;  %v878_v3 = vld [vmem:[#allocation8 + $0x60] sm:$0xff]  ;;  %v882_v4 = vld [vmem:[#allocation6 + $0x78] sm:$0xff]  ;;  %s802_s26 = smov [#allocation11]   ;;  %s598_s30 = sshll.u32 %s1234_s6, 4  ;;  %s599_s30 = int_to_ptr.hbm [resolvable:$true] %s598_s30 }
  0x16   :  { %180 = vmatpush.msra.mxu2 %v867_v0  ;;  %v885_v5 = vld [vmem:[#allocation8 + $0x58] sm:$0xff]  ;;  %200 = vmatpush.msra.mxu3 %v882_v4  ;;  %v890_v6 = vld [vmem:[#allocation6 + $0x70] sm:$0xff]  ;;  %v898_v8 = vld [vmem:[#allocation6 + $0x68] sm:$0xff]  ;;  %s596_s27 = sshll.u32 %s802_s26, 4  ;;  %s597_s27 = int_to_ptr.vmem [resolvable:$true] %s596_s27 }
  0x17   :  { %131 = vmatpush.msra.mxu1 %v869_v1  ;;  %325 = vmatpush.msra.mxu0 %v869_v1  ;;  %v893_v7 = vld [vmem:[#allocation8 + $0x50] sm:$0xff]  ;;  %v901_v9 = vld [vmem:[#allocation8 + $0x48] sm:$0xff]  ;;  %v906_v10 = vld [vmem:[#allocation6 + $0x60] sm:$0xff] }
  0x18   :  { %181 = vmatpush.msra.mxu2 %v869_v1  ;;  %201 = vmatpush.msra.mxu3 %v890_v6  ;;  %v909_v11 = vld [vmem:[#allocation8 + $0x40] sm:$0xff]  ;;  %v914_v12 = vld [vmem:[#allocation6 + $0x58] sm:$0xff]  ;;  %v922_v14 = vld [vmem:[#allocation6 + $0x50] sm:$0xff] }
  0x19   :  { %132 = vmatpush.msra.mxu1 %v873_v2  ;;  %326 = vmatpush.msra.mxu0 %v873_v2  ;;  %v917_v13 = vld [vmem:[#allocation8 + $0x38] sm:$0xff]  ;;  %v925_v15 = vld [vmem:[#allocation8 + $0x30] sm:$0xff]  ;;  %v930_v16 = vld [vmem:[#allocation6 + $0x48] sm:$0xff] }
  0x1a   :  { %182 = vmatpush.msra.mxu2 %v873_v2  ;;  %202 = vmatpush.msra.mxu3 %v898_v8  ;;  %v933_v17 = vld [vmem:[#allocation8 + $0x28] sm:$0xff]  ;;  %v938_v18 = vld [vmem:[#allocation6 + $0x40] sm:$0xff]  ;;  %v946_v20 = vld [vmem:[#allocation6 + $0x38] sm:$0xff] }
  0x1b   :  { %133 = vmatpush.msra.mxu1 %v878_v3  ;;  %327 = vmatpush.msra.mxu0 %v878_v3  ;;  %v941_v19 = vld [vmem:[#allocation8 + $0x20] sm:$0xff]  ;;  %v949_v21 = vld [vmem:[#allocation8 + $0x18] sm:$0xff]  ;;  %v954_v22 = vld [vmem:[#allocation6 + $0x30] sm:$0xff] }
  0x1c   :  { %183 = vmatpush.msra.mxu2 %v878_v3  ;;  %203 = vmatpush.msra.mxu3 %v906_v10  ;;  %v957_v23 = vld [vmem:[#allocation8 + $0x10] sm:$0xff]  ;;  %v962_v24 = vld [vmem:[#allocation6 + $0x28] sm:$0xff]  ;;  %v970_v26 = vld [vmem:[#allocation6 + $0x20] sm:$0xff] }
  0x1d   :  { %134 = vmatpush.msra.mxu1 %v885_v5  ;;  %328 = vmatpush.msra.mxu0 %v885_v5  ;;  %v965_v25 = vld [vmem:[#allocation8 + $0x8] sm:$0xff]  ;;  %v973_v27 = vld [vmem:[#allocation8] sm:$0xff]  ;;  %v978_v28 = vld [vmem:[#allocation6 + $0x18] sm:$0xff] }
  0x1e   :  { %184 = vmatpush.msra.mxu2 %v885_v5  ;;  %204 = vmatpush.msra.mxu3 %v914_v12  ;;  %v129_v29 = vld [vmem:[#allocation3] sm:$0xff]  ;;  %v988_v31 = vld [vmem:[#allocation6 + $0x10] sm:$0xff]  ;;  %v994_v32 = vld [vmem:[#allocation6 + $0x8] sm:$0xff] }
  0x1f   :  { %135 = vmatpush.msra.mxu1 %v893_v7  ;;  %329 = vmatpush.msra.mxu0 %v893_v7  ;;  %v323_v30 = vld [vmem:[#allocation3 + $0x20] sm:$0xff]  ;;  %v538_v34 = vld [vmem:[#allocation9 + $0x78] sm:$0xff]  ;;  %v537_v35 = vld [vmem:[#allocation9 + $0x70] sm:$0xff] }
  0x20   :  { %185 = vmatpush.msra.mxu2 %v893_v7  ;;  %205 = vmatpush.msra.mxu3 %v922_v14  ;;  %v1000_v33 = vld [vmem:[#allocation6] sm:$0xff]  ;;  %v536_v37 = vld [vmem:[#allocation9 + $0x68] sm:$0xff]  ;;  %v534_v39 = vld [vmem:[#allocation9 + $0x58] sm:$0xff] }
  0x21   :  { %136 = vmatpush.msra.mxu1 %v901_v9  ;;  %330 = vmatpush.msra.mxu0 %v901_v9  ;;  %v535_v38 = vld [vmem:[#allocation9 + $0x60] sm:$0xff]  ;;  %v533_v40 = vld [vmem:[#allocation9 + $0x50] sm:$0xff]  ;;  %v532_v41 = vld [vmem:[#allocation9 + $0x48] sm:$0xff] }
  0x22   :  { %186 = vmatpush.msra.mxu2 %v901_v9  ;;  %206 = vmatpush.msra.mxu3 %v930_v16  ;;  %v531_v42 = vld [vmem:[#allocation9 + $0x40] sm:$0xff]  ;;  %v530_v43 = vld [vmem:[#allocation9 + $0x38] sm:$0xff]  ;;  %v529_v44 = vld [vmem:[#allocation9 + $0x30] sm:$0xff] }
  0x23   :  { %137 = vmatpush.msra.mxu1 %v909_v11  ;;  %331 = vmatpush.msra.mxu0 %v909_v11  ;;  %v528_v45 = vld [vmem:[#allocation9 + $0x28] sm:$0xff]  ;;  %v527_v46 = vld [vmem:[#allocation9 + $0x20] sm:$0xff]  ;;  %v419_v47 = vld [vmem:[#allocation3 + $0x30] sm:$0xff] }
  0x24   :  { %187 = vmatpush.msra.mxu2 %v909_v11  ;;  %207 = vmatpush.msra.mxu3 %v938_v18  ;;  %v526_v48 = vld [vmem:[#allocation9 + $0x18] sm:$0xff]  ;;  %v525_v49 = vld [vmem:[#allocation9 + $0x10] sm:$0xff]  ;;  %v524_v50 = vld [vmem:[#allocation9 + $0x8] sm:$0xff] }
  0x25   :  { %138 = vmatpush.msra.mxu1 %v917_v13  ;;  %332 = vmatpush.msra.mxu0 %v917_v13  ;;  %v179_v51 = vld [vmem:[#allocation3 + $0x8] sm:$0xff]  ;;  %v523_v52 = vld [vmem:[#allocation9] sm:$0xff]  ;;  %v227_v59 = vld [vmem:[#allocation3 + $0x10] sm:$0xff] }
  0x26   :  { %188 = vmatpush.msra.mxu2 %v917_v13  ;;  %208 = vmatpush.msra.mxu3 %v946_v20  ;;  %v1107_v54 = vld [vmem:[%s1231_s3] ss:$0 sm:$0xff] }
  0x27   :  { %139 = vmatpush.msra.mxu1 %v925_v15  ;;  %333 = vmatpush.msra.mxu0 %v925_v15  ;;  %v1146_v62 = vld [vmem:[%s1233_s5] ss:$0 sm:$0xff]  ;;  %s801_s5 = smov [#allocation12]  }
  0x28   :  { %189 = vmatpush.msra.mxu2 %v925_v15  ;;  %209 = vmatpush.msra.mxu3 %v954_v22  ;;  %s610_s22 = sshll.u32 %s801_s5, 4  ;;  %s611_s22 = int_to_ptr.vmem [resolvable:$true] %s610_s22 }
  0x29   :  { %140 = vmatpush.msra.mxu1 %v933_v17  ;;  %334 = vmatpush.msra.mxu0 %v933_v17 }
  0x2a   :  { %190 = vmatpush.msra.mxu2 %v933_v17  ;;  %210 = vmatpush.msra.mxu3 %v962_v24 }
  0x2b   :  { %141 = vmatpush.msra.mxu1 %v941_v19  ;;  %335 = vmatpush.msra.mxu0 %v941_v19 }
  0x2c   :  { %191 = vmatpush.msra.mxu2 %v941_v19  ;;  %211 = vmatpush.msra.mxu3 %v970_v26 }
  0x2d   :  { %142 = vmatpush.msra.mxu1 %v949_v21  ;;  %336 = vmatpush.msra.mxu0 %v949_v21 }
  0x2e   :  { %192 = vmatpush.msra.mxu2 %v949_v21  ;;  %212 = vmatpush.msra.mxu3 %v978_v28 }
  0x2f   :  { %143 = vmatpush.msra.mxu1 %v957_v23  ;;  %337 = vmatpush.msra.mxu0 %v957_v23 }
  0x30   :  { %193 = vmatpush.msra.mxu2 %v957_v23  ;;  %213 = vmatpush.msra.mxu3 %v988_v31 }
  0x31   :  { %144 = vmatpush.msra.mxu1 %v965_v25  ;;  %338 = vmatpush.msra.mxu0 %v965_v25 }
  0x32   :  { %194 = vmatpush.msra.mxu2 %v965_v25  ;;  %214 = vmatpush.msra.mxu3 %v994_v32 }
  0x33   :  { %145 = vmatpush.msra.mxu1 %v973_v27  ;;  %339 = vmatpush.msra.mxu0 %v973_v27 }
  0x34   :  { %146 = vmatmul.f32.vlgmr.msra.gmra.mxu1 %v129_v29  ;;  %340 = vmatmul.f32.vlgmr.msra.gmra.mxu0 %v323_v30 }
  0x35   :  { %150 = vmatpush.msrb.mxu1 %v882_v4  ;;  %420 = vmatpush.msrb.mxu0 %v867_v0 }
  0x36   :  { %195 = vmatpush.msra.mxu2 %v973_v27  ;;  %215 = vmatpush.msra.mxu3 %v1000_v33 }
  0x37   :  { %151 = vmatpush.msrb.mxu1 %v890_v6  ;;  %421 = vmatpush.msrb.mxu0 %v869_v1 }
  0x38   :  { %228 = vmatpush.msrb.mxu2 %v867_v0  ;;  %296 = vmatpush.msrb.mxu3 %v882_v4 }
  0x39   :  { %152 = vmatpush.msrb.mxu1 %v898_v8  ;;  %422 = vmatpush.msrb.mxu0 %v873_v2 }
  0x3a   :  { %229 = vmatpush.msrb.mxu2 %v869_v1  ;;  %297 = vmatpush.msrb.mxu3 %v890_v6 }
  0x3b   :  { %153 = vmatpush.msrb.mxu1 %v906_v10  ;;  %423 = vmatpush.msrb.mxu0 %v878_v3 }
  0x3c   :  { %230 = vmatpush.msrb.mxu2 %v873_v2  ;;  %298 = vmatpush.msrb.mxu3 %v898_v8 }
  0x3d   :  { %154 = vmatpush.msrb.mxu1 %v914_v12  ;;  %424 = vmatpush.msrb.mxu0 %v885_v5 }
  0x3e   :  { %231 = vmatpush.msrb.mxu2 %v878_v3  ;;  %299 = vmatpush.msrb.mxu3 %v906_v10 }
  0x3f   :  { %155 = vmatpush.msrb.mxu1 %v922_v14  ;;  %425 = vmatpush.msrb.mxu0 %v893_v7 }
  0x40   :  { %232 = vmatpush.msrb.mxu2 %v885_v5  ;;  %300 = vmatpush.msrb.mxu3 %v914_v12 }
  0x41   :  { %156 = vmatpush.msrb.mxu1 %v930_v16  ;;  %426 = vmatpush.msrb.mxu0 %v901_v9 }
  0x42   :  { %233 = vmatpush.msrb.mxu2 %v893_v7  ;;  %301 = vmatpush.msrb.mxu3 %v922_v14 }
  0x43   :  { %157 = vmatpush.msrb.mxu1 %v938_v18  ;;  %427 = vmatpush.msrb.mxu0 %v909_v11 }
  0x44   :  { %234 = vmatpush.msrb.mxu2 %v901_v9  ;;  %302 = vmatpush.msrb.mxu3 %v930_v16 }
  0x45   :  { %158 = vmatpush.msrb.mxu1 %v946_v20  ;;  %428 = vmatpush.msrb.mxu0 %v917_v13 }
  0x46   :  { %235 = vmatpush.msrb.mxu2 %v909_v11  ;;  %303 = vmatpush.msrb.mxu3 %v938_v18 }
  0x47   :  { %159 = vmatpush.msrb.mxu1 %v954_v22  ;;  %429 = vmatpush.msrb.mxu0 %v925_v15 }
  0x48   :  { %236 = vmatpush.msrb.mxu2 %v917_v13  ;;  %304 = vmatpush.msrb.mxu3 %v946_v20 }
  0x49   :  { %160 = vmatpush.msrb.mxu1 %v962_v24  ;;  %430 = vmatpush.msrb.mxu0 %v933_v17 }
  0x4a   :  { %237 = vmatpush.msrb.mxu2 %v925_v15  ;;  %305 = vmatpush.msrb.mxu3 %v954_v22 }
  0x4b   :  { %161 = vmatpush.msrb.mxu1 %v970_v26  ;;  %431 = vmatpush.msrb.mxu0 %v941_v19 }
  0x4c   :  { %238 = vmatpush.msrb.mxu2 %v933_v17  ;;  %306 = vmatpush.msrb.mxu3 %v962_v24 }
  0x4d   :  { %162 = vmatpush.msrb.mxu1 %v978_v28  ;;  %432 = vmatpush.msrb.mxu0 %v949_v21 }
  0x4e   :  { %239 = vmatpush.msrb.mxu2 %v941_v19  ;;  %307 = vmatpush.msrb.mxu3 %v970_v26 }
  0x4f   :  { %163 = vmatpush.msrb.mxu1 %v988_v31  ;;  %433 = vmatpush.msrb.mxu0 %v957_v23 }
  0x50   :  { %240 = vmatpush.msrb.mxu2 %v949_v21  ;;  %308 = vmatpush.msrb.mxu3 %v978_v28 }
  0x51   :  { %164 = vmatpush.msrb.mxu1 %v994_v32  ;;  %434 = vmatpush.msrb.mxu0 %v965_v25 }
  0x52   :  { %241 = vmatpush.msrb.mxu2 %v957_v23  ;;  %309 = vmatpush.msrb.mxu3 %v988_v31 }
  0x53   :  { %165 = vmatpush.msrb.mxu1 %v1000_v33  ;;  %435 = vmatpush.msrb.mxu0 %v973_v27 }
  0x54   :  { %166 = vmatmul.f32.vlgmr.msrb.gmra.mxu1 %v800_v36  ;;  %242 = vmatpush.msrb.mxu2 %v965_v25 }
  0x55   :  { %543 = vmatpush.msra.mxu0 %v538_v34  ;;  %248 = vmatpush.msra.mxu1 %v882_v4 }
  0x56   :  { %243 = vmatpush.msrb.mxu2 %v973_v27  ;;  %310 = vmatpush.msrb.mxu3 %v994_v32 }
  0x57   :  { %544 = vmatpush.msra.mxu0 %v537_v35  ;;  %249 = vmatpush.msra.mxu1 %v890_v6 }
  0x58   :  { %311 = vmatpush.msrb.mxu3 %v1000_v33  ;;  %436 = vmatmul.f32.vlgmr.msrb.gmra.mxu0 %v419_v47 }
  0x59   :  { %545 = vmatpush.msra.mxu0 %v536_v37  ;;  %250 = vmatpush.msra.mxu1 %v898_v8 }
  0x5a   :  { %196 = vmatmul.f32.vlgmr.msra.gmra.mxu2 %v179_v51 }
  0x5b   :  { %546 = vmatpush.msra.mxu0 %v535_v38  ;;  %251 = vmatpush.msra.mxu1 %v906_v10 }
  0x5c   :  { %276 = vmatpush.msra.mxu2 %v867_v0 }
  0x5d   :  { %547 = vmatpush.msra.mxu0 %v534_v39  ;;  %252 = vmatpush.msra.mxu1 %v914_v12 }
  0x5e   :  { %277 = vmatpush.msra.mxu2 %v869_v1 }
  0x5f   :  { %548 = vmatpush.msra.mxu0 %v533_v40  ;;  %253 = vmatpush.msra.mxu1 %v922_v14  ;;  %v275_v40 = vld [vmem:[#allocation3 + $0x18] sm:$0xff] }
  0x60   :  { %278 = vmatpush.msra.mxu2 %v873_v2 }
  0x61   :  { %549 = vmatpush.msra.mxu0 %v532_v41  ;;  %254 = vmatpush.msra.mxu1 %v930_v16 }
  0x62   :  { %279 = vmatpush.msra.mxu2 %v878_v3 }
  0x63   :  { %255 = vmatpush.msra.mxu1 %v938_v18  ;;  %550 = vmatpush.msra.mxu0 %v531_v42 }
  0x64   :  { %280 = vmatpush.msra.mxu2 %v885_v5 }
  0x65   :  { %256 = vmatpush.msra.mxu1 %v946_v20  ;;  %551 = vmatpush.msra.mxu0 %v530_v43 }
  0x66   :  { %281 = vmatpush.msra.mxu2 %v893_v7 }
  0x67   :  { %257 = vmatpush.msra.mxu1 %v954_v22  ;;  %552 = vmatpush.msra.mxu0 %v529_v44 }
  0x68   :  { %282 = vmatpush.msra.mxu2 %v901_v9 }
  0x69   :  { %258 = vmatpush.msra.mxu1 %v962_v24  ;;  %553 = vmatpush.msra.mxu0 %v528_v45  ;;  %v467_v45 = vld [vmem:[#allocation3 + $0x38] sm:$0xff] }
  0x6a   :  { %283 = vmatpush.msra.mxu2 %v909_v11 }
  0x6b   :  { %259 = vmatpush.msra.mxu1 %v970_v26  ;;  %554 = vmatpush.msra.mxu0 %v527_v46 }
  0x6c   :  { %284 = vmatpush.msra.mxu2 %v917_v13 }
  0x6d   :  { %260 = vmatpush.msra.mxu1 %v978_v28  ;;  %555 = vmatpush.msra.mxu0 %v526_v48 }
  0x6e   :  { %285 = vmatpush.msra.mxu2 %v925_v15 }
  0x6f   :  { %261 = vmatpush.msra.mxu1 %v988_v31  ;;  %556 = vmatpush.msra.mxu0 %v525_v49 }
  0x70   :  { %286 = vmatpush.msra.mxu2 %v933_v17 }
  0x71   :  { %262 = vmatpush.msra.mxu1 %v994_v32  ;;  %557 = vmatpush.msra.mxu0 %v524_v50 }
  0x72   :  { %287 = vmatpush.msra.mxu2 %v941_v19 }
  0x73   :  { %263 = vmatpush.msra.mxu1 %v1000_v33  ;;  %558 = vmatpush.msra.mxu0 %v523_v52 }
  0x74   :  { %288 = vmatpush.msra.mxu2 %v949_v21 }
  0x75   :  { %344 = vmatpush.msrb.mxu1 %v882_v4  ;;  %244 = vmatmul.f32.vlgmr.msrb.gmra.mxu2 %v227_v59 }
  0x76   :  { %289 = vmatpush.msra.mxu2 %v957_v23 }
  0x77   :  { %345 = vmatpush.msrb.mxu1 %v890_v6 }
  0x78   :  { %290 = vmatpush.msra.mxu2 %v965_v25 }
  0x79   :  { %346 = vmatpush.msrb.mxu1 %v898_v8 }
  0x7a   :  { %291 = vmatpush.msra.mxu2 %v973_v27 }
  0x7b   :  { %347 = vmatpush.msrb.mxu1 %v906_v10 }
  0x7c   :  { %372 = vmatpush.msrb.mxu2 %v867_v0 }
  0x7d   :  { %348 = vmatpush.msrb.mxu1 %v914_v12  ;;  %292 = vmatmul.f32.vlgmr.msra.gmra.mxu2 %v275_v40 }
  0x7e   :  { %373 = vmatpush.msrb.mxu2 %v869_v1 }
  0x7f   :  { %349 = vmatpush.msrb.mxu1 %v922_v14 }
  0x80   :  { %374 = vmatpush.msrb.mxu2 %v873_v2 }
  0x81   :  { %350 = vmatpush.msrb.mxu1 %v930_v16 }
  0x82   :  { %375 = vmatpush.msrb.mxu2 %v878_v3 }
  0x83   :  { %351 = vmatpush.msrb.mxu1 %v938_v18 }
  0x84   :  { %376 = vmatpush.msrb.mxu2 %v885_v5 }
  0x85   :  { %352 = vmatpush.msrb.mxu1 %v946_v20 }
  0x86   :  { %377 = vmatpush.msrb.mxu2 %v893_v7 }
  0x87   :  { %353 = vmatpush.msrb.mxu1 %v954_v22 }
  0x88   :  { %378 = vmatpush.msrb.mxu2 %v901_v9 }
  0x89   :  { %354 = vmatpush.msrb.mxu1 %v962_v24 }
  0x8a   :  { %379 = vmatpush.msrb.mxu2 %v909_v11 }
  0x8b   :  { %355 = vmatpush.msrb.mxu1 %v970_v26 }
  0x8c   :  { %380 = vmatpush.msrb.mxu2 %v917_v13 }
  0x8d   :  { %356 = vmatpush.msrb.mxu1 %v978_v28 }
  0x8e   :  { %381 = vmatpush.msrb.mxu2 %v925_v15 }
  0x8f   :  { %357 = vmatpush.msrb.mxu1 %v988_v31 }
  0x90   :  { %382 = vmatpush.msrb.mxu2 %v933_v17 }
  0x91   :  { %358 = vmatpush.msrb.mxu1 %v994_v32 }
  0x92   :  { %383 = vmatpush.msrb.mxu2 %v941_v19 }
  0x93   :  { %359 = vmatpush.msrb.mxu1 %v1000_v33 }
  0x94   :  { %384 = vmatpush.msrb.mxu2 %v949_v21 }
  0x96   :  { %385 = vmatpush.msrb.mxu2 %v957_v23 }
  0x98   :  { %386 = vmatpush.msrb.mxu2 %v965_v25 }
  0x9a   :  { %387 = vmatpush.msrb.mxu2 %v973_v27 }
  0x9c   :  { %468 = vmatpush.msra.mxu2 %v867_v0 }
  0x9e   :  { %469 = vmatpush.msra.mxu2 %v869_v1 }
  0xa0   :  { %470 = vmatpush.msra.mxu2 %v873_v2 }
  0xa2   :  { %471 = vmatpush.msra.mxu2 %v878_v3 }
  0xa4   :  { %472 = vmatpush.msra.mxu2 %v885_v5 }
  0xa6   :  { %473 = vmatpush.msra.mxu2 %v893_v7 }
  0xa8   :  { %474 = vmatpush.msra.mxu2 %v901_v9 }
  0xaa   :  { %475 = vmatpush.msra.mxu2 %v909_v11 }
  0xac   :  { %476 = vmatpush.msra.mxu2 %v917_v13 }
  0xae   :  { %477 = vmatpush.msra.mxu2 %v925_v15 }
  0xb0   :  { %478 = vmatpush.msra.mxu2 %v933_v17 }
  0xb1   :  { %v147_v53 = vpop.f32.mrf.mxu1  ;;  %v1130_v60 = vpop.f32.mrf.mxu0 }
  0xb2   :  { %479 = vmatpush.msra.mxu2 %v941_v19 }
  0xb4   :  { %480 = vmatpush.msra.mxu2 %v949_v21 }
  0xb6   :  { %481 = vmatpush.msra.mxu2 %v957_v23 }
  0xb8   :  { %482 = vmatpush.msra.mxu2 %v965_v25 }
  0xba   :  { %483 = vmatpush.msra.mxu2 %v973_v27 }
  0xd1   :  { %v167_v55 = vpop.f32.mrf.mxu1 }
  0xd2   :  { %v168_v56 = vadd.f32 %v167_v55, %v147_v53 }
  0xd4   :  { %v173_v57 = vadd.f32 %v1107_v54, %v168_v56 }
  0xd5   :  { %v1137_v61 = vpop.f32.mrf.mxu0 }
  0xd6   :  { %v176_v58 = vmax.f32 %v173_v57, 0.0 }
  0xd8   :  { %216 = vmatmul.f32.vlgmr.msra.gmra.mxu3 %v176_v58  ;;  %559 = vmatmul.f32.vlgmr.msra.gmra.mxu0 %v176_v58  ;;  %v221_v37 = vmul.f32 0.99, %v176_v58 }
  0xd9   :  { %392 = vmatpush.msra.mxu3 %v882_v4 }
  0xdb   :  { %393 = vmatpush.msra.mxu3 %v890_v6 }
  0xdd   :  { %394 = vmatpush.msra.mxu3 %v898_v8  ;;  %v197_v30 = vpop.f32.mrf.mxu2 }
  0xdf   :  { %395 = vmatpush.msra.mxu3 %v906_v10 }
  0xe1   :  { %396 = vmatpush.msra.mxu3 %v914_v12 }
  0xe3   :  { %397 = vmatpush.msra.mxu3 %v922_v14 }
  0xe5   :  { %398 = vmatpush.msra.mxu3 %v930_v16 }
  0xe7   :  { %399 = vmatpush.msra.mxu3 %v938_v18 }
  0xe9   :  { %400 = vmatpush.msra.mxu3 %v946_v20 }
  0xeb   :  { %401 = vmatpush.msra.mxu3 %v954_v22 }
  0xed   :  { %402 = vmatpush.msra.mxu3 %v962_v24 }
  0xef   :  { %403 = vmatpush.msra.mxu3 %v970_v26 }
  0xf1   :  { %404 = vmatpush.msra.mxu3 %v978_v28 }
  0xf3   :  { %405 = vmatpush.msra.mxu3 %v988_v31 }
  0xf5   :  { %406 = vmatpush.msra.mxu3 %v994_v32 }
  0xf7   :  { %407 = vmatpush.msra.mxu3 %v1000_v33 }
  0xf8   :  { %v245_v0 = vpop.f32.mrf.mxu2 }
 0x155   :  { %v560_v63 = vpop.f32.mrf.mxu0 }
 0x156   :  { %v561_v29 = vadd.f32 %v1146_v62, %v560_v63 }
 0x158   :  { %584 = vst [vmem:[#allocation11] sm:$0xff] %v561_v29 }
 0x15b   :  { %v217_v34 = vpop.f32.mrf.mxu3 }
 0x15c   :  { %v218_v35 = vadd.f32 %v217_v34, %v197_v30 }
 0x15e   :  { %v220_v36 = vadd.f32 %v1107_v54, %v218_v35 }
 0x160   :  { %v222_v38 = vadd.f32 %v221_v37, %v220_v36 }
 0x162   :  { %v223_v39 = vmax.f32 %v222_v38, 0.0 }
 0x164   :  { %264 = vmatmul.f32.vlgmr.msra.gmra.mxu1 %v223_v39  ;;  %562 = vmatmul.f32.gmra.mxu0 %v223_v39  ;;  %v269_v9 = vmul.f32 0.99, %v223_v39 }
 0x165   :  { %440 = vmatpush.msra.mxu1 %v882_v4 }
 0x167   :  { %441 = vmatpush.msra.mxu1 %v890_v6 }
 0x169   :  { %442 = vmatpush.msra.mxu1 %v898_v8 }
 0x16b   :  { %443 = vmatpush.msra.mxu1 %v906_v10 }
 0x16d   :  { %444 = vmatpush.msra.mxu1 %v914_v12 }
 0x16f   :  { %445 = vmatpush.msra.mxu1 %v922_v14 }
 0x171   :  { %446 = vmatpush.msra.mxu1 %v930_v16 }
 0x173   :  { %447 = vmatpush.msra.mxu1 %v938_v18 }
 0x175   :  { %448 = vmatpush.msra.mxu1 %v946_v20 }
 0x177   :  { %449 = vmatpush.msra.mxu1 %v954_v22 }
 0x179   :  { %450 = vmatpush.msra.mxu1 %v962_v24 }
 0x17b   :  { %451 = vmatpush.msra.mxu1 %v970_v26 }
 0x17d   :  { %452 = vmatpush.msra.mxu1 %v978_v28 }
 0x17f   :  { %453 = vmatpush.msra.mxu1 %v988_v31 }
 0x181   :  { %454 = vmatpush.msra.mxu1 %v994_v32 }
 0x183   :  { %455 = vmatpush.msra.mxu1 %v1000_v33 }
 0x1e1   :  { %v265_v1 = vpop.f32.mrf.mxu1  ;;  %v563_v2 = vpop.f32.mrf.mxu0 }
 0x1e2   :  { %v266_v3 = vadd.f32 %v265_v1, %v245_v0  ;;  %v564_v5 = vadd.f32 %v1146_v62, %v563_v2 }
 0x1e4   :  { %v268_v7 = vadd.f32 %v1107_v54, %v266_v3  ;;  %585 = vst [vmem:[#allocation11 + $0x8] sm:$0xff] %v564_v5 }
 0x1e6   :  { %v270_v11 = vadd.f32 %v269_v9, %v268_v7 }
 0x1e8   :  { %v271_v13 = vmax.f32 %v270_v11, 0.0 }
 0x1ea   :  { %312 = vmatmul.f32.vlgmr.msrb.gmra.mxu3 %v271_v13  ;;  %565 = vmatmul.f32.gmra.mxu0 %v271_v13  ;;  %v317_v15 = vmul.f32 0.99, %v271_v13 }
 0x1eb   :  { %488 = vmatpush.msrb.mxu3 %v882_v4 }
 0x1ed   :  { %489 = vmatpush.msrb.mxu3 %v890_v6 }
 0x1ef   :  { %490 = vmatpush.msrb.mxu3 %v898_v8  ;;  %v293_v8 = vpop.f32.mrf.mxu2 }
 0x1f1   :  { %491 = vmatpush.msrb.mxu3 %v906_v10 }
 0x1f3   :  { %492 = vmatpush.msrb.mxu3 %v914_v12 }
 0x1f5   :  { %493 = vmatpush.msrb.mxu3 %v922_v14 }
 0x1f7   :  { %494 = vmatpush.msrb.mxu3 %v930_v16 }
 0x1f9   :  { %495 = vmatpush.msrb.mxu3 %v938_v18  ;;  %v371_v18 = vld [vmem:[#allocation3 + $0x28] sm:$0xff] }
 0x1fa   :  { %388 = vmatmul.f32.vlgmr.msrb.gmra.mxu2 %v371_v18 }
 0x1fb   :  { %496 = vmatpush.msrb.mxu3 %v946_v20 }
 0x1fd   :  { %497 = vmatpush.msrb.mxu3 %v954_v22 }
 0x1ff   :  { %498 = vmatpush.msrb.mxu3 %v962_v24 }
 0x201   :  { %499 = vmatpush.msrb.mxu3 %v970_v26 }
 0x202   :  { %484 = vmatmul.f32.vlgmr.msra.gmra.mxu2 %v467_v45 }
 0x203   :  { %500 = vmatpush.msrb.mxu3 %v978_v28 }
 0x205   :  { %501 = vmatpush.msrb.mxu3 %v988_v31 }
 0x207   :  { %502 = vmatpush.msrb.mxu3 %v994_v32 }
 0x209   :  { %503 = vmatpush.msrb.mxu3 %v1000_v33 }
 0x267   :  { %v566_v4 = vpop.f32.mrf.mxu0 }
 0x268   :  { %v567_v6 = vadd.f32 %v1146_v62, %v566_v4 }
 0x26a   :  { %586 = vst [vmem:[#allocation11 + $0x10] sm:$0xff] %v567_v6 }
 0x26d   :  { %v313_v10 = vpop.f32.mrf.mxu3 }
 0x26e   :  { %v314_v12 = vadd.f32 %v313_v10, %v293_v8 }
 0x270   :  { %v316_v14 = vadd.f32 %v1107_v54, %v314_v12 }
 0x272   :  { %v318_v16 = vadd.f32 %v317_v15, %v316_v14 }
 0x274   :  { %v319_v17 = vmax.f32 %v318_v16, 0.0 }
 0x276   :  { %360 = vmatmul.f32.vlgmr.msrb.gmra.mxu1 %v319_v17  ;;  %568 = vmatmul.f32.gmra.mxu0 %v319_v17  ;;  %v365_v24 = vmul.f32 0.99, %v319_v17 }
 0x27d   :  { %v389_v31 = vpop.f32.mrf.mxu2 }
 0x285   :  { %v485_v57 = vpop.f32.mrf.mxu2 }
 0x2f3   :  { %v361_v19 = vpop.f32.mrf.mxu1  ;;  %v569_v20 = vpop.f32.mrf.mxu0 }
 0x2f4   :  { %v362_v21 = vadd.f32 %v361_v19, %v1130_v60  ;;  %v570_v22 = vadd.f32 %v1146_v62, %v569_v20 }
 0x2f6   :  { %v364_v23 = vadd.f32 %v1107_v54, %v362_v21  ;;  %587 = vst [vmem:[#allocation11 + $0x18] sm:$0xff] %v570_v22 }
 0x2f8   :  { %v366_v25 = vadd.f32 %v365_v24, %v364_v23 }
 0x2fa   :  { %v367_v26 = vmax.f32 %v366_v25, 0.0 }
 0x2fc   :  { %408 = vmatmul.f32.vlgmr.msra.gmra.mxu3 %v367_v26  ;;  %571 = vmatmul.f32.gmra.mxu0 %v367_v26  ;;  %v413_v42 = vmul.f32 0.99, %v367_v26 }
 0x379   :  { %v572_v27 = vpop.f32.mrf.mxu0 }
 0x37a   :  { %v573_v28 = vadd.f32 %v1146_v62, %v572_v27 }
 0x37c   :  { %588 = vst [vmem:[#allocation11 + $0x20] sm:$0xff] %v573_v28 }
 0x37f   :  { %v409_v32 = vpop.f32.mrf.mxu3 }
 0x380   :  { %v410_v33 = vadd.f32 %v409_v32, %v389_v31 }
 0x382   :  { %v412_v41 = vadd.f32 %v1107_v54, %v410_v33 }
 0x384   :  { %v414_v43 = vadd.f32 %v413_v42, %v412_v41 }
 0x386   :  { %v415_v44 = vmax.f32 %v414_v43, 0.0 }
 0x388   :  { %456 = vmatmul.f32.vlgmr.msra.gmra.mxu1 %v415_v44  ;;  %574 = vmatmul.f32.gmra.mxu0 %v415_v44  ;;  %v461_v51 = vmul.f32 0.99, %v415_v44 }
 0x405   :  { %v457_v46 = vpop.f32.mrf.mxu1  ;;  %v575_v47 = vpop.f32.mrf.mxu0 }
 0x406   :  { %v458_v48 = vadd.f32 %v457_v46, %v1137_v61  ;;  %v576_v49 = vadd.f32 %v1146_v62, %v575_v47 }
 0x408   :  { %v460_v50 = vadd.f32 %v1107_v54, %v458_v48  ;;  %589 = vst [vmem:[#allocation11 + $0x28] sm:$0xff] %v576_v49 }
 0x40a   :  { %v462_v52 = vadd.f32 %v461_v51, %v460_v50 }
 0x40c   :  { %v463_v53 = vmax.f32 %v462_v52, 0.0 }
 0x40e   :  { %504 = vmatmul.f32.vlgmr.msrb.gmra.mxu3 %v463_v53  ;;  %577 = vmatmul.f32.gmra.mxu0 %v463_v53  ;;  %v509_v61 = vmul.f32 0.99, %v463_v53 }
 0x48b   :  { %v578_v55 = vpop.f32.mrf.mxu0 }
 0x48c   :  { %v579_v56 = vadd.f32 %v1146_v62, %v578_v55 }
 0x48e   :  { %590 = vst [vmem:[#allocation11 + $0x30] sm:$0xff] %v579_v56 }
 0x491   :  { %v505_v58 = vpop.f32.mrf.mxu3 }
 0x492   :  { %v506_v59 = vadd.f32 %v505_v58, %v485_v57 }
 0x494   :  { %v508_v60 = vadd.f32 %v1107_v54, %v506_v59 }
 0x496   :  { %v510_v63 = vadd.f32 %v509_v61, %v508_v60 }
 0x498   :  { %v511_v29 = vmax.f32 %v510_v63, 0.0 }
 0x49a   :  { %580 = vmatmul.f32.gmra.mxu0 %v511_v29  ;;  %514 = vst [vmem:[#allocation12] sm:$0xff] %v511_v29 }
 0x49b   :  { %615 = dma.vmem_to_hbm [thread:$0]  %s611_s22, 128, %s613_s25, [#allocation13]  }
 0x517   :  { %v581_v54 = vpop.f32.mrf.mxu0 }
 0x518   :  { %v582_v30 = vadd.f32 %v1146_v62, %v581_v54 }
 0x51a   :  { %591 = vst [vmem:[#allocation11 + $0x38] sm:$0xff] %v582_v30 }
 0x51b   :  { %604 = dma.vmem_to_hbm [thread:$0]  %s597_s27, 1024, %s599_s30, [#allocation5], %s795_s9, %s795_s9, %s796_s10  }
 0x51c   :  { %790 = dma.done.wait [#allocation5], 1024  }
 0x51d   :  { %791 = vsyncadd [#allocation5], 4294966272 }
 0x51e   :  { %792 = dma.done.wait [#allocation13], 128  }
 0x51f   :  { %793 = vsyncadd [#allocation13], 4294967168 }
 0x520   :  { %624 = vsyncpa [#allocation4], 1 }
 0x521   :  { %625 = vsyncpa [#allocation7], 1 }
 0x522   :  { %626 = vsyncpa [#allocation10], 1 }
 0x523   :  { %627 = vsyncpa [#allocation5], 1 }
 0x524   :  { %628 = vsyncpa [#allocation13], 1 }

</bundles_post_ra>
